<compile_context>
chip_gen: v7x
topology: tpu7x:2x2x1
jax: 0.10.0
libtpu: 0.0.40
codegen_flags: <defaults>
</compile_context>

<pallas_src>
import math
from functools import lru_cache, partial

import numpy as np

import jax
import jax.numpy as jnp
from jax import lax
from jax.experimental import pallas as pl
from jax.experimental.pallas import tpu as pltpu


# ------------------------------ small utilities ------------------------------

def _round_up(a, b):
    return -(-a // b) * b


def _vmem_capacity_bytes():
    try:
        return int(pltpu.get_tpu_info().vmem_capacity_bytes)
    except Exception:
        return 64 << 20                      # v7x-safe conservative fallback


def _tile_bytes(rows, cols, itemsize):
    """Bytes of a (rows, cols) VMEM tile including (sublane, lane) padding."""
    sub = {4: 8, 2: 16, 1: 32}.get(itemsize, 8)
    return _round_up(max(rows, 1), sub) * _round_up(max(cols, 1), 128) * itemsize


def _plan_channel_tiles(C, row_bytes1, row_bytes2, budget1, budget2):
    """Pick (c_pad, tc1, tc2).

    Tiles must divide c_pad and be a multiple of 8 (or equal c_pad) so the
    (8,128) layout rule holds; each tile is sized against a per-block VMEM
    budget computed from the lane-padded block bytes.  If C has no acceptable
    divisor, channels are zero-padded to a multiple of 8 (exact for the gram;
    extra rows are sliced off after kernel 2)."""
    def best_div(Ct, row_bytes, budget):
        divs = [d for d in range(1, Ct + 1)
                if Ct % d == 0 and (d % 8 == 0 or d == Ct)]
        fit = [d for d in divs if d * row_bytes <= budget]
        return max(fit) if fit else None

    t1 = best_div(C, row_bytes1, budget1)
    t2 = best_div(C, row_bytes2, budget2)
    if t1 is not None and t2 is not None:
        return C, t1, t2

    c_pad = _round_up(C, 8)

    def best_m8(Ct, row_bytes, budget):
        cands = [d for d in range(8, Ct + 1, 8)
                 if Ct % d == 0 and d * row_bytes <= budget]
        return max(cands) if cands else 8

    return (c_pad,
            best_m8(c_pad, row_bytes1, budget1),
            best_m8(c_pad, row_bytes2, budget2))


@lru_cache(maxsize=None)
def _pool_matrix(H, W, h1, w1, bs, pad):
    """Dense (H*W, h1*w1) AvgPool2d(kernel=bs, stride=bs, padding=pad,
    count_include_pad=True) factor (entries 1/bs^2), bf16 for the MXU.
    # TODO(synk): for very large spatial maps (H*W >~ 16K) this dense factor
    # should be replaced by a separable two-matmul path to bound VMEM."""
    pm = np.zeros((H * W, h1 * w1), np.float32)
    inv = 1.0 / (bs * bs)
    for i in range(h1):
        for h in range(max(0, i * bs - pad), min(H, i * bs - pad + bs)):
            for j in range(w1):
                for w in range(max(0, j * bs - pad), min(W, j * bs - pad + bs)):
                    pm[h * W + w, i * w1 + j] = inv
    return jnp.asarray(pm, dtype=jnp.bfloat16)


# --------------------- kernel 1: pool (1 matmul) + gram ----------------------

def _pool_gram_kernel(x_ref, pm_ref, g_ref):
    # x_ref : (tc1, H*W) input dtype (lane-dense)
    # pm_ref: (H*W, hw1) bf16 pooling factor
    # g_ref : (hw1, hw1) f32 partial-gram output block; its index does not
    #         depend on the channel grid axis, so it stays resident in VMEM
    #         and is accumulated in place (P3 pattern, no scratch copy).
    c = pl.program_id(2)

    @pl.when(c == 0)
    def _init():
        g_ref[...] = jnp.zeros_like(g_ref)

    # Pooling: one consolidated MXU matmul (replaces h1 tiny per-window calls
    # and the masked xg scratch stores).  f32 accumulation.
    xg = jnp.dot(x_ref[...].astype(jnp.bfloat16), pm_ref[...],
                 preferred_element_type=jnp.float32)          # (tc1, hw1)
    xg = xg.astype(jnp.bfloat16)

    # Gram accumulation over channels: G += xg^T @ xg.
    # TODO(synk): verify via pl.lower_as_mlir that the dim-0 contraction maps
    # to the MXU transposed-LHS path (no per-step vxpose).
    g_ref[...] += lax.dot_general(xg, xg, (((0,), (0,)), ((), ())),
                                  preferred_element_type=jnp.float32)


# ----------------------- kernel 2: lane-dense mask apply ---------------------

def _apply_mask_kernel(x_ref, m_ref, scale_ref, o_ref):
    # x_ref: (tc2, H*W) input dtype   m_ref: (1, H*W) f32
    # scale_ref: (1,) f32 in SMEM     o_ref: (tc2, H*W) input dtype
    s = scale_ref[0]
    o_ref[...] = (x_ref[...] * (m_ref[...] * s)).astype(o_ref.dtype)


# ------------------------------ jitted forward -------------------------------

@partial(jax.jit,
         static_argnames=("bs", "pad", "h1", "w1", "delta",
                          "c_pad", "tc1", "tc2", "p_split", "vmem_limit"))
def _corrdrop_forward(x, key, drop_prob, pm, *, bs, pad, h1, w1, delta,
                      c_pad, tc1, tc2, p_split, vmem_limit):
    N, C, H, W = x.shape
    hw, hw1 = H * W, h1 * w1
    out_dtype = x.dtype

    # Lane-dense channel-major view (free reshape); zero-pad channels only in
    # the rare no-good-divisor case (exact for the gram).
    x2 = x.reshape(N, C, hw)
    if c_pad != C:
        x2 = jnp.pad(x2, ((0, 0), (0, c_pad - C), (0, 0)))

    n_ct = c_pad // tc1
    cpt = n_ct // p_split

    # ---- Kernel 1: pooled-feature gram, channel axis as a true reduction ----
    g_parts = pl.pallas_call(
        _pool_gram_kernel,
        out_shape=jax.ShapeDtypeStruct((N, p_split, hw1, hw1), jnp.float32),
        grid_spec=pltpu.PrefetchScalarGridSpec(
            num_scalar_prefetch=0,
            grid=(N, p_split, cpt),
            in_specs=[
                pl.BlockSpec((None, tc1, hw),
                             lambda n, p, c: (n, p * cpt + c, 0)),
                pl.BlockSpec((hw, hw1), lambda n, p, c: (0, 0)),
            ],
            out_specs=pl.BlockSpec((None, None, hw1, hw1),
                                   lambda n, p, c: (n, p, 0, 0)),
        ),
        compiler_params=pltpu.CompilerParams(
            dimension_semantics=("parallel", "parallel", "arbitrary"),
            vmem_limit_bytes=vmem_limit),
    )(x2, pm)

    # ---- ortho() normalize + softmax on the tiny (hw1, hw1) gram, f32/XLA ----
    g = jnp.sum(g_parts, axis=1)                              # (N, hw1, hw1)
    d = jnp.diagonal(g, axis1=1, axis2=2)                     # per-position ||.||^2
    inv = lax.rsqrt(d + 1e-8)
    gn = g * inv[:, :, None] * inv[:, None, :]
    eye = jnp.eye(hw1, dtype=jnp.float32)
    rank = jnp.sum(jnp.abs(gn - eye), axis=-1) / hw1          # (N, hw1)
    probs = jax.nn.softmax(rank, axis=-1)
    x_max = probs.reshape(N, 1, h1, w1)

    # ---- random mask sampling glue (torch RNG stream cannot be bit-matched) ----
    block_gamma = drop_prob / (bs * bs) * (float(H * W) / float(h1 * w1))
    k1, k2 = jax.random.split(key)
    x_mask = 1.0 - jax.random.bernoulli(k1, x_max).astype(jnp.float32)
    # NOTE: if sum(x_mask)==0, gamma -> inf and is clipped to 1.0 (drops every
    # block); torch would propagate inf.  Documented behavioral deviation.
    gamma = block_gamma / (jnp.sum(x_mask) / x_mask.size)
    gamma = jnp.clip(gamma, 0.0, 1.0)
    mask = jax.random.bernoulli(k2, gamma, (N, 1, h1, w1)).astype(jnp.float32)
    gather_mask = 1.0 - x_mask * mask                         # (N, 1, h1, w1)

    # ---- nearest upsample by bs + center crop (tiny, C-independent) ----
    gm = gather_mask[:, 0]
    up = jnp.repeat(jnp.repeat(gm, bs, axis=1), bs, axis=2)
    fine = up[:, delta:delta + H, delta:delta + W]            # (N, H, W) f32
    block_sum = jnp.sum(fine)
    numel = float(N * H * W)
    # NOTE: torch divides by block_mask.sum() -> NaN/inf when everything is
    # dropped; here the output becomes all-zero instead (guarded divisor).
    scale = (numel / jnp.maximum(block_sum, 1.0)).astype(jnp.float32).reshape(1)
    fine2 = fine.reshape(N, 1, hw)

    # ---- Kernel 2: fused mask * scale apply, lane-dense, both axes parallel ----
    out2 = pl.pallas_call(
        _apply_mask_kernel,
        out_shape=jax.ShapeDtypeStruct((N, c_pad, hw), out_dtype),
        grid_spec=pltpu.PrefetchScalarGridSpec(
            num_scalar_prefetch=0,
            grid=(N, c_pad // tc2),
            in_specs=[
                pl.BlockSpec((None, tc2, hw), lambda n, c: (n, c, 0)),
                pl.BlockSpec((None, 1, hw), lambda n, c: (n, 0, 0)),
                pl.BlockSpec(memory_space=pltpu.MemorySpace.SMEM),
            ],
            out_specs=pl.BlockSpec((None, tc2, hw), lambda n, c: (n, c, 0)),
        ),
        compiler_params=pltpu.CompilerParams(
            dimension_semantics=("parallel", "parallel"),
            vmem_limit_bytes=vmem_limit),
    )(x2, fine2, scale)

    out = out2[:, :C].reshape(N, C, H, W)
    return out, probs, gather_mask, scale


# --------------------------------- module ------------------------------------

class CorrDropBlockDB:
    """JAX/Pallas port of the PyTorch CorrDropBlockDB module (forward pass)."""

    def __init__(self, drop_prob, block_size):
        self.drop_prob = drop_prob
        self.block_size = block_size
        self.i = 0
        self.drop_values = np.linspace(start=0, stop=drop_prob, num=200)
        self.training = True

    def step(self):
        if self.i < len(self.drop_values):
            self.drop_prob = float(self.drop_values[self.i])
        self.i += 1

    def __call__(self, x, key):
        assert x.ndim == 4, "Expected (N, C, H, W) input"
        if self.training:
            self.step()
        if (not self.training) or self.drop_prob == 0:
            return x, {}

        N, C, H, W = x.shape
        bs = self.block_size
        if bs > H:
            bs = H - 1
            self.block_size = bs
        mask_reduction = bs // 2
        if (H - mask_reduction) <= 0 or (W - mask_reduction) <= 0:
            raise ValueError(
                "Input of shape {} is too small for block_size {}".format(
                    x.shape, bs))

        pad = 0 if H % bs == 0 else math.ceil((bs - H % bs) / 2)
        h1 = (H + 2 * pad - bs) // bs + 1
        w1 = (W + 2 * pad - bs) // bs + 1
        delta = (h1 * bs - H) // 2
        hw, hw1 = H * W, h1 * w1

        pm = _pool_matrix(H, W, h1, w1, bs, pad)             # cached per shape

        # --- VMEM budgeting against the *padded* block layout ---
        itemsize = x.dtype.itemsize
        vmem_cap = max(_vmem_capacity_bytes(), 32 << 20)
        vmem_limit = max(16 << 20,
                         min(int(vmem_cap * 0.85), vmem_cap - (4 << 20)))
        row_bytes = _round_up(hw, 128) * itemsize            # per-channel row
        fixed1 = 2 * _tile_bytes(hw, hw1, 2) + 2 * _tile_bytes(hw1, hw1, 4)
        budget1 = max(256 << 10, min(8 << 20, (vmem_limit - fixed1) // 3))
        fixed2 = 2 * _tile_bytes(1, hw, 4)
        budget2 = max(256 << 10, min(8 << 20, (vmem_limit - fixed2) // 5))

        c_pad, tc1, tc2 = _plan_channel_tiles(C, row_bytes, row_bytes,
                                              budget1, budget2)
        n_ct = c_pad // tc1
        # Split the channel reduction across 2 partial grams when the batch
        # alone cannot feed both v7x TensorCores.
        p_split = 2 if (N == 1 and n_ct >= 2 and n_ct % 2 == 0) else 1

        out, probs, gather_mask, scale = _corrdrop_forward(
            x, key, jnp.asarray(self.drop_prob, dtype=jnp.float32), pm,
            bs=bs, pad=pad, h1=h1, w1=w1, delta=delta,
            c_pad=c_pad, tc1=tc1, tc2=tc2, p_split=p_split,
            vmem_limit=vmem_limit)

        aux = dict(probs=probs, gather_mask=gather_mask, scale=scale,
                   bs=bs, pad=pad, h1=h1, w1=w1, delta=delta)
        return out, aux


# ---------------- pure-JAX references (for self-check only) ------------------

def _ref_probs(x, bs, pad, h1, w1):
    N, C, H, W = x.shape
    xp = jnp.pad(x.astype(jnp.float32), ((0, 0), (0, 0), (pad, pad), (pad, pad)))
    xg = xp[:, :, :h1 * bs, :w1 * bs].reshape(
        N, C, h1, bs, w1, bs).mean(axis=(3, 5))
    vec = xg.reshape(N, C, h1 * w1).transpose(0, 2, 1)
    vec = vec / jnp.sqrt(jnp.sum(vec ** 2, axis=-1, keepdims=True) + 1e-8)
    gram = jnp.einsum('npc,nqc->npq', vec, vec,
                      precision=lax.Precision.HIGHEST)
    p = jnp.abs(gram - jnp.eye(h1 * w1))
    rank = jnp.sum(p, axis=-1) / (h1 * w1)
    return jax.nn.softmax(rank, axis=-1)


def _ref_out(x, gather_mask, bs, delta, scale):
    N, C, H, W = x.shape
    bm = jnp.repeat(jnp.repeat(gather_mask, bs, axis=2), bs, axis=3)
    bm = bm[:, :, delta:delta + H, delta:delta + W]
    return x * bm * scale.reshape(())


if __name__ == "__main__":
    key = jax.random.PRNGKey(0)
    kx, kdrop = jax.random.split(key)
    x = jax.random.normal(kx, (2, 4, 16, 16), jnp.float32)

    m = CorrDropBlockDB(drop_prob=0.1, block_size=4)
    # Advance the linear drop-prob ramp to its final value (torch's step()).
    for _ in range(200):
        m.step()

    out, aux = m(x, kdrop)
    out = jax.block_until_ready(out)

    # Self-checks against pure-JAX references of the deterministic parts.
    # Kernel 1 uses bf16 MXU inputs (f32 accumulation) -> looser tolerance.
    probs_ref = _ref_probs(x, aux["bs"], aux["pad"], aux["h1"], aux["w1"])
    assert jnp.allclose(aux["probs"], probs_ref, rtol=3e-2, atol=2e-3), \
        "probs mismatch"
    out_ref = _ref_out(x, aux["gather_mask"], aux["bs"], aux["delta"],
                       aux["scale"])
    assert jnp.allclose(out, out_ref, rtol=1e-4, atol=1e-5), "output mismatch"

    # TODO(synk): torch.distributions.Bernoulli RNG stream is not
    # bit-reproducible in JAX; sampling uses jax.random with an explicit key.
    print("KERNEL_OK")
</pallas_src>

<mosaic_0001>
module attributes {stable_mosaic.version = 11 : i64} {
  func.func @_pool_gram_kernel(%arg0: i32, %arg1: i32, %arg2: i32, %arg3: memref<1x4x256xf32, #tpu.memory_space<vmem>>, %arg4: memref<256x16xbf16, #tpu.memory_space<vmem>>, %arg5: memref<1x1x16x16xf32, #tpu.memory_space<vmem>>) attributes {dimension_semantics = [#tpu.dimension_semantics<parallel>, #tpu.dimension_semantics<parallel>, #tpu.dimension_semantics<arbitrary>], iteration_bounds = array<i64: 2, 1, 1>, scalar_prefetch = 0 : i64, scratch_operands = 0 : i64, tpu.core_type = #tpu.core_type<tc>, window_params = [{transform_indices = @transform_0, window_bounds = array<i64: 1, 4, 256>}, {pipeline_mode = #tpu.pipeline_mode<synchronous>, transform_indices = @transform_1, window_bounds = array<i64: 256, 16>}, {transform_indices = @transform_2, window_bounds = array<i64: 1, 1, 16, 16>}]} {
    %c0_i32 = arith.constant 0 : i32
    %0 = arith.cmpi eq, %arg2, %c0_i32 : i32
    %1 = arith.extui %0 : i1 to i32
    %c0_i32_0 = arith.constant 0 : i32
    %2 = arith.cmpi ne, %1, %c0_i32_0 : i32
    scf.if %2 {
      %cst_14 = arith.constant 0.000000e+00 : f32
      %16 = vector.broadcast %cst_14 : f32 to vector<16x16xf32>
      %c0_15 = arith.constant 0 : index
      %c0_16 = arith.constant 0 : index
      %c0_17 = arith.constant 0 : index
      %c0_18 = arith.constant 0 : index
      %17 = vector.load %arg5[%c0_15, %c0_16, %c0_17, %c0_18] : memref<1x1x16x16xf32, #tpu.memory_space<vmem>>, vector<1x1x16x16xf32>
      %18 = vector.shape_cast %17 : vector<1x1x16x16xf32> to vector<16x16xf32>
      %19 = vector.shape_cast %16 : vector<16x16xf32> to vector<1x1x16x16xf32>
      tpu.vector_store %arg5[%c0_15, %c0_16, %c0_17, %c0_18], %19 {strides = array<i32>} : memref<1x1x16x16xf32, #tpu.memory_space<vmem>>, vector<1x1x16x16xf32>,
    } else {
    }
    %c0 = arith.constant 0 : index
    %c0_1 = arith.constant 0 : index
    %c0_2 = arith.constant 0 : index
    %3 = vector.load %arg3[%c0, %c0_1, %c0_2] : memref<1x4x256xf32, #tpu.memory_space<vmem>>, vector<1x4x256xf32>
    %4 = vector.shape_cast %3 : vector<1x4x256xf32> to vector<4x256xf32>
    %5 = arith.truncf %4 : vector<4x256xf32> to vector<4x256xbf16>
    %c0_3 = arith.constant 0 : index
    %c0_4 = arith.constant 0 : index
    %6 = vector.load %arg4[%c0_3, %c0_4] : memref<256x16xbf16, #tpu.memory_space<vmem>>, vector<256x16xbf16>
    %cst = arith.constant dense<0.000000e+00> : vector<4x16xf32>
    %7 = tpu.matmul %5, %6, %cst {dimension_numbers = #tpu.dot_dimension_numbers<[1], [0], [0], [1], [0, 0, 1, 1], [], []>} : vector<4x256xbf16>, vector<256x16xbf16>, vector<4x16xf32> -> vector<4x16xf32>
    %8 = arith.truncf %7 : vector<4x16xf32> to vector<4x16xbf16>
    %c0_5 = arith.constant 0 : index
    %c0_6 = arith.constant 0 : index
    %c0_7 = arith.constant 0 : index
    %c0_8 = arith.constant 0 : index
    %9 = vector.load %arg5[%c0_5, %c0_6, %c0_7, %c0_8] : memref<1x1x16x16xf32, #tpu.memory_space<vmem>>, vector<1x1x16x16xf32>
    %10 = vector.shape_cast %9 : vector<1x1x16x16xf32> to vector<16x16xf32>
    %cst_9 = arith.constant dense<0.000000e+00> : vector<16x16xf32>
    %11 = tpu.matmul %8, %8, %cst_9 {dimension_numbers = #tpu.dot_dimension_numbers<[0], [0], [1], [1], [0, 1, 1, 1], [], []>} : vector<4x16xbf16>, vector<4x16xbf16>, vector<16x16xf32> -> vector<16x16xf32>
    %12 = arith.addf %10, %11 : vector<16x16xf32>
    %c0_10 = arith.constant 0 : index
    %c0_11 = arith.constant 0 : index
    %c0_12 = arith.constant 0 : index
    %c0_13 = arith.constant 0 : index
    %13 = vector.load %arg5[%c0_10, %c0_11, %c0_12, %c0_13] : memref<1x1x16x16xf32, #tpu.memory_space<vmem>>, vector<1x1x16x16xf32>
    %14 = vector.shape_cast %13 : vector<1x1x16x16xf32> to vector<16x16xf32>
    %15 = vector.shape_cast %12 : vector<16x16xf32> to vector<1x1x16x16xf32>
    tpu.vector_store %arg5[%c0_10, %c0_11, %c0_12, %c0_13], %15 {strides = array<i32>} : memref<1x1x16x16xf32, #tpu.memory_space<vmem>>, vector<1x1x16x16xf32>,
    return
  }
  func.func @transform_0(%arg0: i32, %arg1: i32, %arg2: i32) -> (i32, i32, i32) {
    %c1_i32 = arith.constant 1 : i32
    %0 = arith.muli %arg1, %c1_i32 : i32
    %1 = arith.addi %0, %arg2 : i32
    %c0_i32 = arith.constant 0 : i32
    %c0_i32_0 = arith.constant 0 : i32
    return %arg0, %1, %c0_i32 : i32, i32, i32
  }
  func.func @transform_1(%arg0: i32, %arg1: i32, %arg2: i32) -> (i32, i32) {
    %c0_i32 = arith.constant 0 : i32
    %c0_i32_0 = arith.constant 0 : i32
    %c0_i32_1 = arith.constant 0 : i32
    return %c0_i32, %c0_i32_0 : i32, i32
  }
  func.func @transform_2(%arg0: i32, %arg1: i32, %arg2: i32) -> (i32, i32, i32, i32) {
    %c0_i32 = arith.constant 0 : i32
    %c0_i32_0 = arith.constant 0 : i32
    %c0_i32_1 = arith.constant 0 : i32
    return %arg0, %arg1, %c0_i32, %c0_i32_0 : i32, i32, i32, i32
  }
}

module attributes {stable_mosaic.version = 11 : i64} {
  func.func @_apply_mask_kernel(%arg0: i32, %arg1: i32, %arg2: memref<1x4x256xf32, #tpu.memory_space<vmem>>, %arg3: memref<1x1x256xf32, #tpu.memory_space<vmem>>, %arg4: memref<1xf32, #tpu.memory_space<smem>>, %arg5: memref<1x4x256xf32, #tpu.memory_space<vmem>>) attributes {dimension_semantics = [#tpu.dimension_semantics<parallel>, #tpu.dimension_semantics<parallel>], iteration_bounds = array<i64: 2, 1>, scalar_prefetch = 0 : i64, scratch_operands = 0 : i64, tpu.core_type = #tpu.core_type<tc>, window_params = [{transform_indices = @transform_0, window_bounds = array<i64: 1, 4, 256>}, {transform_indices = @transform_1, window_bounds = array<i64: 1, 1, 256>}, {transform_indices = @transform_2, window_bounds = array<i64: 1>}, {transform_indices = @transform_3, window_bounds = array<i64: 1, 4, 256>}]} {
    %c0 = arith.constant 0 : index
    %0 = memref.load %arg4[%c0] : memref<1xf32, #tpu.memory_space<smem>>
    %c0_0 = arith.constant 0 : index
    %c0_1 = arith.constant 0 : index
    %c0_2 = arith.constant 0 : index
    %1 = vector.load %arg2[%c0_0, %c0_1, %c0_2] : memref<1x4x256xf32, #tpu.memory_space<vmem>>, vector<1x4x256xf32>
    %2 = vector.shape_cast %1 : vector<1x4x256xf32> to vector<4x256xf32>
    %c0_3 = arith.constant 0 : index
    %c0_4 = arith.constant 0 : index
    %c0_5 = arith.constant 0 : index
    %3 = vector.load %arg3[%c0_3, %c0_4, %c0_5] : memref<1x1x256xf32, #tpu.memory_space<vmem>>, vector<1x1x256xf32>
    %4 = vector.shape_cast %3 : vector<1x1x256xf32> to vector<1x256xf32>
    %5 = vector.broadcast %0 : f32 to vector<1x256xf32>
    %6 = arith.mulf %4, %5 : vector<1x256xf32>
    %7 = vector.broadcast %6 : vector<1x256xf32> to vector<4x256xf32>
    %8 = arith.mulf %2, %7 : vector<4x256xf32>
    %c0_6 = arith.constant 0 : index
    %c0_7 = arith.constant 0 : index
    %c0_8 = arith.constant 0 : index
    %9 = vector.load %arg5[%c0_6, %c0_7, %c0_8] : memref<1x4x256xf32, #tpu.memory_space<vmem>>, vector<1x4x256xf32>
    %10 = vector.shape_cast %9 : vector<1x4x256xf32> to vector<4x256xf32>
    %11 = vector.shape_cast %8 : vector<4x256xf32> to vector<1x4x256xf32>
    tpu.vector_store %arg5[%c0_6, %c0_7, %c0_8], %11 {strides = array<i32>} : memref<1x4x256xf32, #tpu.memory_space<vmem>>, vector<1x4x256xf32>,
    return
  }
  func.func @transform_0(%arg0: i32, %arg1: i32) -> (i32, i32, i32) {
    %c0_i32 = arith.constant 0 : i32
    %c0_i32_0 = arith.constant 0 : i32
    return %arg0, %arg1, %c0_i32 : i32, i32, i32
  }
  func.func @transform_1(%arg0: i32, %arg1: i32) -> (i32, i32, i32) {
    %c0_i32 = arith.constant 0 : i32
    %c0_i32_0 = arith.constant 0 : i32
    %c0_i32_1 = arith.constant 0 : i32
    return %arg0, %c0_i32, %c0_i32_0 : i32, i32, i32
  }
  func.func @transform_2(%arg0: i32, %arg1: i32) -> i32 {
    %c0_i32 = arith.constant 0 : i32
    %c0_i32_0 = arith.constant 0 : i32
    return %c0_i32 : i32
  }
  func.func @transform_3(%arg0: i32, %arg1: i32) -> (i32, i32, i32) {
    %c0_i32 = arith.constant 0 : i32
    %c0_i32_0 = arith.constant 0 : i32
    return %arg0, %arg1, %c0_i32 : i32, i32, i32
  }
}

</mosaic_0001>

<bundles_post_ra>
// kernel: _corrdrop_forward.4
= control target key start
LH: loop header
LB: loop body
LE: loop exit
PB: predicated region body
PF: predicated region fallthrough
CT: control target
= control target key end

     0   :  { %s689_s9 = smov 0   ;;  %s691_s10 = smov 0   ;;  %s778_s0 = inlined_call_operand.vmem [shape: f32[2,4,256], index: 0, kind: input, shape index: {}]   ;;  %s779_s1 = inlined_call_operand.vmem [shape: bf16[256,16], index: 1, kind: input, shape index: {}]   ;;  %s780_s2 = inlined_call_operand.vmem [shape: f32[2,1,16,16], index: 2, kind: output, shape index: {}]  }
   0x1   :  { %s693_s11 = smov 0  }
   0x2 LB: > { %s31_s12 = sadd.s32 1, %s666_s10  ;;  %p548_p0 = scmp.ge.s32.totalorder %s670_s11, 1  ;;  %s670_s11 = sphi %s693_s11, %s12_s11   ;;  %s666_s10 = sphi %s691_s10, %s782_s10   ;;  %s662_s9 = sphi %s689_s9, %s781_s9  }
   0x3   : > { %p33_p1 = scmp.ge.s32.totalorder %s31_s12, 2  ;;  %p143_p2 = scmp.lt.s32.totalorder %s670_s11, 3 }
   0x5   : > { %s784_s12 = smov (%p33_p1, %s31_s12), 0  ;;  %p144_p3 = pnand %p548_p0, %p143_p2 }
   0x6   : > { %v631_v0 = vld [vmem:[%s779_s1 + $0x40] sm:$0xff] (!%p144_p3)   ;;  %v633_v2 = vld [vmem:[%s779_s1 + $0x48] sm:$0xff] (!%p144_p3)   ;;  %p175_p4 = scmp.lt.s32.totalorder (!%p144_p3), %s662_s9, 1  ;;  %v635_v4 = vld [vmem:[%s779_s1 + $0x50] sm:$0xff] (!%p144_p3)   ;;  %vm199_vm0 = vcmask (!%p144_p3), 130048   ;;  %v672_v20 = vmov (!%p144_p3), 0.0  }
   0x7   : > { %147 = sbr.rel (%p144_p3) target bundleno = 576 (0x240), region = 28  ;;  %v632_v1 = vld [vmem:[%s779_s1] sm:$0xff] (!%p144_p3)   ;;  %574 = vmatprep.subr.bf16.mxu0 (!%p144_p3), %v631_v0  ;;  %v634_v3 = vld [vmem:[%s779_s1 + $0x8] sm:$0xff] (!%p144_p3)   ;;  %v636_v5 = vld [vmem:[%s779_s1 + $0x10] sm:$0xff] (!%p144_p3)   ;;  %598 = vmatprep.subr.bf16.mxu1 (!%p144_p3), %v672_v20  ;;  %vm673_vm1 = vmmov (!%p144_p3), 0   ;;  %vm399_vm2 = vcmask (!%p144_p3), 1041408  }
   0x8   : > { %575 = vmatpush3.bf16.msra.mxu0 (!%p144_p3), %v632_v1  ;;  %v637_v6 = vld [vmem:[%s779_s1 + $0x58] sm:$0xff] (!%p144_p3)   ;;  %v639_v8 = vld [vmem:[%s779_s1 + $0x60] sm:$0xff] (!%p144_p3)   ;;  %v641_v10 = vld [vmem:[%s779_s1 + $0x68] sm:$0xff] (!%p144_p3)   ;;  %600 = vmatprep.mubr.msk.bf16.mxu1 (!%p144_p3), %vm673_vm1, %v672_v20  ;;  %vm395_vm3 = vcmask (!%p144_p3), 31744  }
   0x9   : > { %576 = vmatprep.subr.bf16.mxu0 (!%p144_p3), %v633_v2  ;;  %v638_v7 = vld [vmem:[%s779_s1 + $0x18] sm:$0xff] (!%p144_p3)   ;;  %v640_v9 = vld [vmem:[%s779_s1 + $0x20] sm:$0xff] (!%p144_p3)   ;;  %v642_v13 = vld [vmem:[%s779_s1 + $0x28] sm:$0xff] (!%p144_p3)  }
   0xa   : > { %v643_v15 = vld [vmem:[%s779_s1 + $0x70] sm:$0xff] (!%p144_p3)   ;;  %v645_v17 = vld [vmem:[%s779_s1 + $0x78] sm:$0xff] (!%p144_p3)  }
   0xb   : > { %v644_v16 = vld [vmem:[%s779_s1 + $0x30] sm:$0xff] (!%p144_p3)   ;;  %v646_v18 = vld [vmem:[%s779_s1 + $0x38] sm:$0xff] (!%p144_p3)  }
   0xc   : > { %577 = vmatpush3.bf16.msra.mxu0 (!%p144_p3), %v634_v3 }
   0xd   : > { %578 = vmatprep.subr.bf16.mxu0 (!%p144_p3), %v635_v4 }
   0xe   : > { %s786_s9 = smov (!%p175_p4, %s662_s9), 1 }
   0xf   : > { %s572_s27 = sshll.u32 %s786_s9, 3  ;;  %s573_s25 = sshll.u32 %s786_s9, 4 }
  0x10   : > { %579 = vmatpush3.bf16.msra.mxu0 %v636_v5  ;;  %s183_s6 = scalar_lea.vmem %s778_s0, %s572_s27  ;;  %s193_s28 = scalar_lea.vmem %s780_s2, %s573_s25 }
  0x11   : > { %580 = vmatprep.subr.bf16.mxu0 %v637_v6  ;;  %v202_v11 = vld [vmem:[%s183_s6] sm:$0xff]  ;;  %200 = vst.msk [vmem:[%s193_s28] sm:$0xff] %vm199_vm0, %v672_v20  ;;  %201 = vst.msk [vmem:[%s193_s28 + $0x8] sm:$0xff] %vm199_vm0, %v672_v20 }
  0x12   : > { %v204_v12 = vcombine.high %v202_v11, %v202_v11  ;;  %v206_v19 = vpack.c.bf16 %v202_v11, %v202_v11 }
  0x14   : > { %581 = vmatpush3.bf16.msra.mxu0 %v638_v7  ;;  %v207_v14 = vpack.c.bf16 %v204_v12, %v204_v12 }
  0x15   : > { %582 = vmatprep.subr.bf16.mxu0 %v639_v8 }
  0x16   : > { %368 = vmatprep.mubr.bf16.mxu0 %v207_v14 }
  0x18   : > { %583 = vmatpush3.bf16.msra.mxu0 %v640_v9  ;;  %v377_v29 = vld [vmem:[%s193_s28] sm:$0xff]  ;;  %v378_v31 = vld [vmem:[%s193_s28 + $0x8] sm:$0xff] }
  0x19   : > { %584 = vmatprep.subr.bf16.mxu0 %v641_v10 }
  0x1c   : > { %585 = vmatpush3.bf16.msra.mxu0 %v642_v13 }
  0x1d   : > { %586 = vmatprep.subr.bf16.mxu0 %v643_v15 }
  0x20   : > { %587 = vmatpush3.bf16.msra.mxu0 %v644_v16 }
  0x21   : > { %588 = vmatprep.subr.bf16.mxu0 %v645_v17 }
  0x24   : > { %589 = vmatpush3.bf16.msra.mxu0 %v646_v18 }
  0x27   : > { %369 = vmatmul.mubr.bf16.vlgmr.msra.gmra.mrb[0].mxu0 %v206_v19 }
  0xfa   : > { %v590_v21 = vpop.f32.mrb[0].mxu0 }
  0xfb   : > { %v591_v22 = vpop.f32.mrb[1].mxu0 }
  0xfc   : > { %v592_v23 = vadd.f32 %v591_v22, %v590_v21  ;;  %v593_v24 = vpop.f32.mrb[2].mxu0 }
  0xfd   : > { %v594_v25 = vpop.f32.mrb[3].mxu0 }
  0xfe   : > { %v376_v26 = vpack.c.bf16 %v592_v23, %v592_v23 }
 0x100   : > { %379 = vxpose.xlu0.c.b16.start.end [1/1] (short) (narrow) %v376_v26, 16  ;;  %v401_v27 = vsel %vm399_vm2, %v376_v26, 0 }
 0x101   : > { %599 = vmatpush3.bf16.msra.mxu1 %v401_v27 }
 0x166   : > { %v387_v28 = vpop.trf.xlu0 }
 0x167   : > { %601 = vmatmul.mubr.msk.bf16.vlgmr.msra.gmra.mrb[0].mxu1 %vm395_vm3, %v387_v28 }
 0x23a   : > { %v437_v30 = vpop.f32.mrb[0].mxu1 }
 0x23b   : > { %v444_v32 = vadd.f32 %v437_v30, %v377_v29  ;;  %v602_v33 = vpop.f32.mrb[1].mxu1 }
 0x23c   : > { %v440_v34 = vpop.f32.mrb[2].mxu1 }
 0x23d   : > { %447 = vst.msk [vmem:[%s193_s28] sm:$0xff] %vm199_vm0, %v444_v32  ;;  %v445_v35 = vadd.f32 %v440_v34, %v378_v31  ;;  %v603_v36 = vpop.f32.mrb[3].mxu1 }
 0x23f   : > { %448 = vst.msk [vmem:[%s193_s28 + $0x8] sm:$0xff] %vm199_vm0, %v445_v35 }
 0x240 PF: > { %s12_s11 = sadd.s32 1, %s670_s11   ;;  %s781_s9 = smov %s666_s10 }
 0x241   : > { %p9_p5 = scmp.ge.s32.totalorder %s12_s11, 4   ;;  %s782_s10 = smov %s784_s12 }
 0x243   :  { %11 = sbr.rel (!%p9_p5) target bundleno = 2 (0x2), region = 62 }

// kernel: _corrdrop_forward.5
= control target key start
LH: loop header
LB: loop body
LE: loop exit
PB: predicated region body
PF: predicated region fallthrough
CT: control target
= control target key end

     0   :  { %s432_s14 = smov 0   ;;  %s434_s15 = smov 0   ;;  %s465_s0 = inlined_call_operand.vmem [shape: f32[2,4,256], index: 0, kind: input, shape index: {}]   ;;  %s466_s1 = inlined_call_operand.vmem [shape: f32[2,1,256], index: 1, kind: input, shape index: {}]   ;;  %s467_s2 = inlined_call_operand.<no memory space> [shape: f32[1], index: 2, kind: input, shape index: {}]   ;;  %s468_s3 = inlined_call_operand.vmem [shape: f32[2,4,256], index: 3, kind: output, shape index: {}]  }
   0x1   :  { %8 = sst [smem:[#allocation2]] %s467_s2  ;;  %s436_s16 = smov 0  }
   0x2 LB: > { %s26_s2 = sadd.s32 1, %s403_s15  ;;  %p351_p0 = scmp.ge.s32.totalorder %s407_s16, 1  ;;  %s407_s16 = sphi %s436_s16, %s14_s16   ;;  %s403_s15 = sphi %s434_s15, %s470_s15   ;;  %s399_s14 = sphi %s432_s14, %s469_s14  }
   0x3   : > { %p28_p1 = scmp.ge.s32.totalorder %s26_s2, 2  ;;  %p167_p2 = scmp.lt.s32.totalorder %s407_s16, 3 }
   0x5   : > { %s472_s2 = smov (%p28_p1, %s26_s2), 0  ;;  %p168_p3 = pnand %p351_p0, %p167_p2 }
   0x6   : > { %p203_p4 = scmp.lt.s32.totalorder (!%p168_p3), %s399_s14, 1  ;;  %s225_s17 = sld [smem:[#allocation2]] (!%p168_p3)  ;;  %v231_v0 = vlaneseq (!%p168_p3) }
   0x7   : > { %171 = sbr.rel (%p168_p3) target bundleno = 27 (0x1b), region = 32 }
   0x8   : > { %v232_v1 = vshrl.u32 (!%p168_p3), %v231_v0, 7 }
   0xa   : > { %v233_v2 = vsub.s32 (!%p168_p3), 0, %v232_v1  ;;  %v237_v3 = vsub.s32 (!%p168_p3), 1, %v232_v1 }
   0xc   : > { %v228_v5 = vstv (!%p168_p3), %s225_s17 }
   0xe   : > { %s474_s14 = smov (!%p203_p4, %s399_s14), 1 }
   0xf   : > { %s359_s18 = sshll.u32 %s474_s14, 3  ;;  %s354_s19 = sshll.u32 %s474_s14, 1 }
  0x10   : > { %s215_s22 = scalar_lea.vmem %s466_s1, %s354_s19  ;;  %s211_s25 = scalar_lea.vmem %s465_s0, %s359_s18 }
  0x11   : > { %v227_v4 = vld [vmem:[%s215_s22] sm:$0x3]  ;;  %s224_s28 = scalar_lea.vmem %s468_s3, %s359_s18 }
  0x12   : > { %v229_v6 = vmul.f32 %v228_v5, %v227_v4  ;;  %v226_v9 = vld [vmem:[%s211_s25] sm:$0xff] }
  0x14   : > { %v234_v7 = vrot.slane %v229_v6, %v233_v2  ;;  %v238_v8 = vrot.slane %v229_v6, %v237_v3 }
  0x16   : > { %v239_v10 = vcombine.low %v234_v7, %v238_v8 }
  0x18   : > { %v241_v11 = vmul.f32 %v239_v10, %v226_v9 }
  0x1a   : > { %242 = vst [vmem:[%s224_s28] sm:$0xff] %v241_v11 }
  0x1b PF: > { %s14_s16 = sadd.s32 1, %s407_s16   ;;  %s469_s14 = smov %s403_s15 }
  0x1c   : > { %p11_p5 = scmp.ge.s32.totalorder %s14_s16, 4   ;;  %s470_s15 = smov %s472_s2 }
  0x1e   :  { %13 = sbr.rel (!%p11_p5) target bundleno = 2 (0x2), region = 65 }

</bundles_post_ra>
